<compile_context>
chip_gen: v7x
topology: tpu7x:2x2x1
jax: 0.10.0
libtpu: 0.0.40
codegen_flags: <defaults>
</compile_context>

<pallas_src>
from itertools import combinations

import numpy as np

import jax
import jax.numpy as jnp
from jax import lax
from jax.experimental import pallas as pl
from jax.experimental.pallas import tpu as pltpu


def _round_up(x, m):
    return ((x + m - 1) // m) * m


_HIGHEST = lax.Precision.HIGHEST


# ----------------------------- kernels -------------------------------------


def _bi_interaction_kernel(x_ref, r_ref, o_ref):
    # x_ref: (TB, F*D) lane-dense, r_ref: (F*D, D) stacked identities,
    # o_ref: (TB, D)
    x = x_ref[...].astype(jnp.float32)
    # Field reduction on the MXU (idle otherwise): sum over fields.
    s = jnp.dot(x, r_ref[...], precision=_HIGHEST,
                preferred_element_type=jnp.float32)            # (TB, D)
    sq = jnp.dot(x * x, r_ref[...], precision=_HIGHEST,
                 preferred_element_type=jnp.float32)           # (TB, D)
    o_ref[...] = ((s * s - sq) * 0.5).astype(o_ref.dtype)


def _product_sum_pooling_kernel(x_ref, r_ref, o_ref):
    # x_ref: (TB, F*D), r_ref: (F*D, D), o_ref: (TB, 1)
    x = x_ref[...].astype(jnp.float32)
    s = jnp.dot(x, r_ref[...], precision=_HIGHEST,
                preferred_element_type=jnp.float32)            # (TB, D)
    term1 = jnp.sum(s * s, axis=-1, keepdims=True)             # (TB, 1) XLU
    term2 = jnp.sum(x * x, axis=-1, keepdims=True)             # (TB, 1) XLU
    o_ref[...] = ((term1 - term2) * 0.5).astype(o_ref.dtype)


def _elementwise_product_kernel(x_ref, sp_ref, sq_ref, o_ref):
    # x_ref: (TB, F*D), sp_ref/sq_ref: (F*D, P*D) 0/1 selection matrices,
    # o_ref: (TB, P*D) -- one lane-dense store instead of P masked stores.
    x = x_ref[...].astype(jnp.float32)
    e1 = jnp.dot(x, sp_ref[...], precision=_HIGHEST,
                 preferred_element_type=jnp.float32)           # (TB, P*D)
    e2 = jnp.dot(x, sq_ref[...], precision=_HIGHEST,
                 preferred_element_type=jnp.float32)           # (TB, P*D)
    o_ref[...] = (e1 * e2).astype(o_ref.dtype)


# ----------------------------- wrapper --------------------------------------


class InnerProductLayer:
    """JAX/Pallas re-implementation of the PyTorch InnerProductLayer."""

    _SUPPORTED = ('product_sum_pooling', 'Bi_interaction_pooling',
                  'inner_product', 'elementwise_product')

    # Batch tile: big enough for >=1 MiB blocks / good pipelining, small
    # enough to fit comfortably in the scoped VMEM of v5e/v6e/v7x.
    _MAX_TB = 2048

    def __init__(self, combs=None, output='product_sum_pooling'):
        if output not in self._SUPPORTED:
            raise ValueError(
                'InnerProductLayer output={} is not supported.'.format(output))
        self._output_type = output
        p, q = combs
        # Deterministic "parameters" (non-trainable index buffers in PyTorch).
        self.field_p = tuple(int(i) for i in p)
        self.field_q = tuple(int(i) for i in q)

    def __call__(self, feature_emb):
        B, F, D = feature_emb.shape
        FD = F * D
        in_itemsize = jnp.dtype(feature_emb.dtype).itemsize

        # Lane-dense 2D slab (pure layout reshape, no data movement).
        x2d = feature_emb.reshape(B, FD)

        # Tile the batch; pad the tail so no rows are dropped.
        TB = min(self._MAX_TB, _round_up(B, 8))
        B_pad = _round_up(B, TB)
        if B_pad != B:
            x2d = jnp.pad(x2d, ((0, B_pad - B), (0, 0)))
        grid = (B_pad // TB,)

        x_spec = pl.BlockSpec((TB, FD), lambda b: (b, 0))
        compiler_params = pltpu.CompilerParams(
            dimension_semantics=("parallel",),
            vmem_limit_bytes=32 * 1024 * 1024)
        in_bytes = B_pad * FD * in_itemsize

        if self._output_type in ('product_sum_pooling', 'Bi_interaction_pooling'):
            # (F*D, D) stack of identities: x @ red == sum over fields.
            red = jnp.asarray(np.tile(np.eye(D, dtype=np.float32), (F, 1)))
            red_spec = pl.BlockSpec((FD, D), lambda b: (0, 0))

            if self._output_type == 'Bi_interaction_pooling':
                kernel = _bi_interaction_kernel
                out_shape = jax.ShapeDtypeStruct((B_pad, D), jnp.float32)
                out_spec = pl.BlockSpec((TB, D), lambda b: (b, 0))
                out_bytes = B_pad * D * 4
                flops = 4 * B_pad * FD * D + 4 * B_pad * FD
            else:
                kernel = _product_sum_pooling_kernel
                out_shape = jax.ShapeDtypeStruct((B_pad, 1), jnp.float32)
                out_spec = pl.BlockSpec((TB, 1), lambda b: (b, 0))
                out_bytes = B_pad * 4
                flops = 2 * B_pad * FD * D + 6 * B_pad * FD

            out = pl.pallas_call(
                kernel,
                out_shape=out_shape,
                grid_spec=pltpu.PrefetchScalarGridSpec(
                    num_scalar_prefetch=0,
                    grid=grid,
                    in_specs=[x_spec, red_spec],
                    out_specs=out_spec,
                ),
                compiler_params=compiler_params,
                cost_estimate=pl.CostEstimate(
                    flops=int(flops),
                    transcendentals=0,
                    bytes_accessed=int(in_bytes + out_bytes + red.size * 4)),
            )(x2d, red)
            return out[:B]

        elif self._output_type == 'elementwise_product':
            P = len(self.field_p)
            PD = P * D
            eye = np.eye(D, dtype=np.float32)
            sel_p = np.zeros((FD, PD), dtype=np.float32)
            sel_q = np.zeros((FD, PD), dtype=np.float32)
            for k, (pi, qi) in enumerate(zip(self.field_p, self.field_q)):
                sel_p[pi * D:(pi + 1) * D, k * D:(k + 1) * D] = eye
                sel_q[qi * D:(qi + 1) * D, k * D:(k + 1) * D] = eye
            sel_p = jnp.asarray(sel_p)
            sel_q = jnp.asarray(sel_q)
            sel_spec = pl.BlockSpec((FD, PD), lambda b: (0, 0))

            out_shape = jax.ShapeDtypeStruct((B_pad, PD), jnp.float32)
            out_spec = pl.BlockSpec((TB, PD), lambda b: (b, 0))
            out_bytes = B_pad * PD * 4
            flops = 4 * B_pad * FD * PD + B_pad * PD

            out = pl.pallas_call(
                _elementwise_product_kernel,
                out_shape=out_shape,
                grid_spec=pltpu.PrefetchScalarGridSpec(
                    num_scalar_prefetch=0,
                    grid=grid,
                    in_specs=[x_spec, sel_spec, sel_spec],
                    out_specs=out_spec,
                ),
                compiler_params=compiler_params,
                cost_estimate=pl.CostEstimate(
                    flops=int(flops),
                    transcendentals=0,
                    bytes_accessed=int(in_bytes + out_bytes + 2 * FD * PD * 4)),
            )(x2d, sel_p, sel_q)
            return out[:B].reshape(B, P, D)

        else:
            # 'inner_product' — reference forward has no branch for it.
            raise NotImplementedError(
                "'inner_product' has no forward semantics in the reference.")


# ----------------------------- reference ------------------------------------


def _reference(feature_emb, output_type, field_p, field_q):
    x = feature_emb.astype(jnp.float32)
    if output_type in ('product_sum_pooling', 'Bi_interaction_pooling'):
        sum_of_square = jnp.sum(x, axis=1) ** 2
        square_of_sum = jnp.sum(x ** 2, axis=1)
        bi = (sum_of_square - square_of_sum) * 0.5
        if output_type == 'Bi_interaction_pooling':
            return bi
        return jnp.sum(bi, axis=-1, keepdims=True)
    elif output_type == 'elementwise_product':
        emb1 = jnp.take(x, jnp.asarray(field_p), axis=1)
        emb2 = jnp.take(x, jnp.asarray(field_q), axis=1)
        return emb1 * emb2


# ----------------------------- main ------------------------------------------


if __name__ == "__main__":
    batch, num_fields, emb_dim = 2, 4, 32

    key = jax.random.PRNGKey(0)
    feature_emb = jax.random.normal(key, (batch, num_fields, emb_dim),
                                    dtype=jnp.float32)

    # Deterministic combs: all pairwise field combinations, as FuxiCTR does.
    pairs = list(combinations(range(num_fields), 2))
    field_p = [i for i, _ in pairs]
    field_q = [j for _, j in pairs]
    combs = (field_p, field_q)

    ok = True
    for output_type in ('product_sum_pooling', 'Bi_interaction_pooling',
                        'elementwise_product'):
        layer = InnerProductLayer(combs=combs, output=output_type)
        out = layer(feature_emb)
        out = jax.block_until_ready(out)
        ref = _reference(feature_emb, output_type, field_p, field_q)
        if out.shape != ref.shape or not jnp.allclose(out, ref, atol=1e-5,
                                                      rtol=1e-5):
            ok = False

    if ok:
        print("KERNEL_OK")
</pallas_src>

<mosaic_0001>
module attributes {stable_mosaic.version = 11 : i64} {
  func.func @_product_sum_pooling_kernel(%arg0: i32, %arg1: memref<8x128xf32, #tpu.memory_space<vmem>>, %arg2: memref<128x32xf32, #tpu.memory_space<vmem>>, %arg3: memref<8x1xf32, #tpu.memory_space<vmem>>) attributes {dimension_semantics = [#tpu.dimension_semantics<parallel>], iteration_bounds = array<i64: 1>, scalar_prefetch = 0 : i64, scratch_operands = 0 : i64, tpu.core_type = #tpu.core_type<tc>, window_params = [{transform_indices = @transform_0, window_bounds = array<i64: 8, 128>}, {pipeline_mode = #tpu.pipeline_mode<synchronous>, transform_indices = @transform_1, window_bounds = array<i64: 128, 32>}, {transform_indices = @transform_2, window_bounds = array<i64: 8, 1>}]} {
    %c0 = arith.constant 0 : index
    %c0_0 = arith.constant 0 : index
    %0 = vector.load %arg1[%c0, %c0_0] : memref<8x128xf32, #tpu.memory_space<vmem>>, vector<8x128xf32>
    %c0_1 = arith.constant 0 : index
    %c0_2 = arith.constant 0 : index
    %1 = vector.load %arg2[%c0_1, %c0_2] : memref<128x32xf32, #tpu.memory_space<vmem>>, vector<128x32xf32>
    %cst = arith.constant dense<0.000000e+00> : vector<8x32xf32>
    %2 = tpu.matmul %0, %1, %cst {dimension_numbers = #tpu.dot_dimension_numbers<[1], [0], [0], [1], [0, 0, 1, 1], [], []>, precision = #tpu.contract_precision<fp32>} : vector<8x128xf32>, vector<128x32xf32>, vector<8x32xf32> -> vector<8x32xf32>
    %3 = arith.mulf %2, %2 : vector<8x32xf32>
    %cst_3 = arith.constant dense<0.000000e+00> : vector<8xf32>
    %4 = vector.multi_reduction <add>, %3, %cst_3 [1] : vector<8x32xf32> to vector<8xf32>
    %5 = vector.shape_cast %4 : vector<8xf32> to vector<8x1xf32>
    %6 = arith.mulf %0, %0 : vector<8x128xf32>
    %cst_4 = arith.constant dense<0.000000e+00> : vector<8xf32>
    %7 = vector.multi_reduction <add>, %6, %cst_4 [1] : vector<8x128xf32> to vector<8xf32>
    %8 = vector.shape_cast %7 : vector<8xf32> to vector<8x1xf32>
    %9 = arith.subf %5, %8 : vector<8x1xf32>
    %cst_5 = arith.constant 5.000000e-01 : f32
    %10 = vector.broadcast %cst_5 : f32 to vector<8x1xf32>
    %11 = arith.mulf %9, %10 : vector<8x1xf32>
    %c0_6 = arith.constant 0 : index
    %c0_7 = arith.constant 0 : index
    %12 = vector.load %arg3[%c0_6, %c0_7] : memref<8x1xf32, #tpu.memory_space<vmem>>, vector<8x1xf32>
    tpu.vector_store %arg3[%c0_6, %c0_7], %11 {strides = array<i32>} : memref<8x1xf32, #tpu.memory_space<vmem>>, vector<8x1xf32>,
    return
  }
  func.func @transform_0(%arg0: i32) -> (i32, i32) {
    %c0_i32 = arith.constant 0 : i32
    %c0_i32_0 = arith.constant 0 : i32
    return %arg0, %c0_i32 : i32, i32
  }
  func.func @transform_1(%arg0: i32) -> (i32, i32) {
    %c0_i32 = arith.constant 0 : i32
    %c0_i32_0 = arith.constant 0 : i32
    %c0_i32_1 = arith.constant 0 : i32
    return %c0_i32, %c0_i32_0 : i32, i32
  }
  func.func @transform_2(%arg0: i32) -> (i32, i32) {
    %c0_i32 = arith.constant 0 : i32
    %c0_i32_0 = arith.constant 0 : i32
    return %arg0, %c0_i32 : i32, i32
  }
}

</mosaic_0001>

<bundles_post_ra>
// kernel: tpu_custom_call.1
= control target key start
LH: loop header
LB: loop body
LE: loop exit
PB: predicated region body
PF: predicated region fallthrough
CT: control target
= control target key end

     0   :  { %v1153_v0 = vmov 0.0|0.0   ;;  %vm1154_vm0 = vmmov 0   ;;  %v1155_v8 = vmov 0.0   ;;  %vm670_vm1 = vcmask 261120   ;;  %s1478_s1 = inlined_call_operand.vmem [shape: f32[128,32], index: 1, kind: input, shape index: {}]   ;;  %s1479_s0 = inlined_call_operand.vmem [shape: f32[8,128], index: 0, kind: input, shape index: {}]   ;;  %s1480_s2 = inlined_call_operand.vmem [shape: f32[8,1], index: 2, kind: output, shape index: {}]  }
   0x1   :  { %997 = vmatprep.subr.bf16.mxu1 %v1153_v0  ;;  %1069 = vmatprep.subr.bf16.mxu0 %v1153_v0  ;;  %v12_v1 = vld [vmem:[%s1478_s1] sm:$0xff]  ;;  %v13_v2 = vld [vmem:[%s1478_s1 + $0x8] sm:$0xff]  ;;  %v14_v3 = vld [vmem:[%s1478_s1 + $0x10] sm:$0xff]  ;;  %vm679_vm2 = vcmask 7168  }
   0x2   :  { %v29_v4 = vand.u32 4294901760, %v12_v1  ;;  %v32_v5 = vand.u32 4294901760, %v13_v2  ;;  %v15_v6 = vld [vmem:[%s1478_s1 + $0x18] sm:$0xff]  ;;  %v35_v7 = vand.u32 4294901760, %v14_v3  ;;  %819 = vmatprep.mubr.msk.f32.mxu1 %vm1154_vm0, %v1155_v8  ;;  %924 = vmatprep.mubr.msk.f32.mxu0 %vm1154_vm0, %v1155_v8  ;;  %v16_v10 = vld [vmem:[%s1478_s1 + $0x20] sm:$0xff]  ;;  %v17_v11 = vld [vmem:[%s1478_s1 + $0x28] sm:$0xff] }
   0x3   :  { %v38_v9 = vand.u32 4294901760, %v15_v6  ;;  %v41_v14 = vand.u32 4294901760, %v16_v10  ;;  %v44_v15 = vand.u32 4294901760, %v17_v11  ;;  %v18_v16 = vld [vmem:[%s1478_s1 + $0x30] sm:$0xff]  ;;  %v19_v17 = vld [vmem:[%s1478_s1 + $0x38] sm:$0xff]  ;;  %v1218_v21 = vld [vmem:[%s1478_s1 + $0x40] sm:$0xff] }
   0x4   :  { %v1195_v12 = vpack.c.bf16 %v32_v5, %v29_v4  ;;  %v47_v19 = vand.u32 4294901760, %v18_v16  ;;  %v50_v20 = vand.u32 4294901760, %v19_v17  ;;  %v1223_v22 = vld [vmem:[%s1478_s1 + $0x48] sm:$0xff]  ;;  %v53_v24 = vand.u32 4294901760, %v1218_v21  ;;  %v1234_v26 = vld [vmem:[%s1479_s0] sm:$0xff]  ;;  %v1241_v27 = vld [vmem:[%s1478_s1 + $0x50] sm:$0xff] }
   0x5   :  { %v1199_v13 = vpack.c.bf16 %v38_v9, %v35_v7  ;;  %v1211_v18 = vpack.c.bf16 %v44_v15, %v41_v14  ;;  %v56_v25 = vand.u32 4294901760, %v1223_v22  ;;  %v1246_v28 = vld [vmem:[%s1478_s1 + $0x58] sm:$0xff]  ;;  %v1248_v29 = vsub.f32 %v12_v1, %v29_v4  ;;  %v1264_v35 = vld [vmem:[%s1478_s1 + $0x60] sm:$0xff]  ;;  %v1271_v36 = vld [vmem:[%s1478_s1 + $0x68] sm:$0xff] }
   0x6   :  { %999 = vmatpush3.bf16.msra.mxu1 %v1195_v12  ;;  %1071 = vmatpush3.bf16.msra.mxu0 %v1195_v12  ;;  %v1227_v23 = vpack.c.bf16 %v50_v20, %v47_v19  ;;  %v1251_v30 = vand.u32 4294901760, %v1234_v26  ;;  %v1253_v31 = vsub.f32 %v13_v2, %v32_v5  ;;  %v59_v33 = vand.u32 4294901760, %v1241_v27  ;;  %v1294_v43 = vld [vmem:[%s1478_s1 + $0x70] sm:$0xff]  ;;  %v1299_v44 = vld [vmem:[%s1478_s1 + $0x78] sm:$0xff] }
   0x7   :  { %1000 = vmatprep.subr.bf16.mxu1 %v1153_v0  ;;  %1072 = vmatprep.subr.bf16.mxu0 %v1153_v0  ;;  %v1257_v32 = vpack.c.bf16 %v56_v25, %v53_v24  ;;  %v62_v34 = vand.u32 4294901760, %v1246_v28  ;;  %v1273_v37 = vsub.f32 %v14_v3, %v35_v7  ;;  %v1275_v38 = vsub.f32 %v15_v6, %v38_v9 }
   0x8   :  { %v65_v39 = vand.u32 4294901760, %v1264_v35  ;;  %v1280_v40 = vsub.f32 %v1234_v26, %v1251_v30  ;;  %v68_v42 = vand.u32 4294901760, %v1271_v36  ;;  %v122_v45 = vand.u32 4294901760, %v1248_v29 }
   0x9   :  { %v1288_v41 = vpack.c.bf16 %v62_v34, %v59_v33  ;;  %v129_v46 = vand.u32 4294901760, %v1253_v31  ;;  %v1305_v47 = vsub.f32 %v16_v10, %v41_v14  ;;  %v1307_v48 = vsub.f32 %v17_v11, %v44_v15 }
   0xa   :  { %1002 = vmatpush3.bf16.msra.mxu1 %v1199_v13  ;;  %1074 = vmatpush3.bf16.msra.mxu0 %v1199_v13  ;;  %v71_v49 = vand.u32 4294901760, %v1294_v43  ;;  %v74_v50 = vand.u32 4294901760, %v1299_v44  ;;  %v111_v51 = vand.u32 4294901760, %v1280_v40  ;;  %v136_v52 = vand.u32 4294901760, %v1273_v37 }
   0xb   :  { %1003 = vmatprep.subr.bf16.mxu1 %v1153_v0  ;;  %1075 = vmatprep.subr.bf16.mxu0 %v1153_v0  ;;  %v1319_v53 = vpack.c.bf16 %v68_v42, %v65_v39  ;;  %v123_v54 = vsub.f32 %v1248_v29, %v122_v45  ;;  %v130_v55 = vsub.f32 %v1253_v31, %v129_v46  ;;  %v143_v56 = vand.u32 4294901760, %v1275_v38 }
   0xc   :  { %v1326_v57 = vsub.f32 %v18_v16, %v47_v19  ;;  %v1328_v58 = vsub.f32 %v19_v17, %v50_v20  ;;  %v112_v59 = vsub.f32 %v1280_v40, %v111_v51  ;;  %v137_v60 = vsub.f32 %v1273_v37, %v136_v52 }
   0xd   :  { %v150_v61 = vand.u32 4294901760, %v1305_v47  ;;  %v157_v62 = vand.u32 4294901760, %v1307_v48  ;;  %v1340_v63 = vpack.c.bf16 %v74_v50, %v71_v49  ;;  %v124_v1 = vand.u32 4294901760, %v123_v54 }
   0xe   :  { %1005 = vmatpush3.bf16.msra.mxu1 %v1211_v18  ;;  %1077 = vmatpush3.bf16.msra.mxu0 %v1211_v18  ;;  %v131_v2 = vand.u32 4294901760, %v130_v55  ;;  %v144_v3 = vsub.f32 %v1275_v38, %v143_v56  ;;  %v1346_v4 = vsub.f32 %v1218_v21, %v53_v24  ;;  %v1349_v5 = vsub.f32 %v1223_v22, %v56_v25 }
   0xf   :  { %1006 = vmatprep.subr.bf16.mxu1 %v1153_v0  ;;  %1078 = vmatprep.subr.bf16.mxu0 %v1153_v0  ;;  %v1094_v6 = vpack.c.bf16 %v129_v46, %v122_v45  ;;  %v113_v7 = vand.u32 4294901760, %v112_v59  ;;  %v138_v9 = vand.u32 4294901760, %v137_v60  ;;  %v151_v10 = vsub.f32 %v1305_v47, %v150_v61 }
  0x10   :  { %v158_v11 = vsub.f32 %v1307_v48, %v157_v62  ;;  %v1022_v14 = vpack.c.bf16 %v131_v2, %v124_v1  ;;  %v145_v15 = vand.u32 4294901760, %v144_v3  ;;  %v164_v16 = vand.u32 4294901760, %v1326_v57 }
  0x11   :  { %v171_v17 = vand.u32 4294901760, %v1328_v58  ;;  %v1362_v19 = vsub.f32 %v1241_v27, %v59_v33  ;;  %v1367_v20 = vsub.f32 %v1246_v28, %v62_v34  ;;  %v1097_v21 = vpack.c.bf16 %v143_v56, %v136_v52 }
  0x12   :  { %1008 = vmatpush3.bf16.msra.mxu1 %v1227_v23  ;;  %1080 = vmatpush3.bf16.msra.mxu0 %v1227_v23  ;;  %v152_v22 = vand.u32 4294901760, %v151_v10  ;;  %v159_v24 = vand.u32 4294901760, %v158_v11  ;;  %v178_v25 = vand.u32 4294901760, %v1346_v4  ;;  %v1025_v45 = vpack.c.bf16 %v145_v15, %v138_v9 }
  0x13   :  { %1009 = vmatprep.subr.bf16.mxu1 %v1153_v0  ;;  %1081 = vmatprep.subr.bf16.mxu0 %v1153_v0  ;;  %v165_v46 = vsub.f32 %v1326_v57, %v164_v16  ;;  %v172_v27 = vsub.f32 %v1328_v58, %v171_v17  ;;  %v185_v33 = vand.u32 4294901760, %v1349_v5  ;;  %v1378_v28 = vsub.f32 %v1264_v35, %v65_v39 }
  0x14   :  { %v1383_v34 = vsub.f32 %v1271_v36, %v68_v42  ;;  %v1100_v52 = vpack.c.bf16 %v157_v62, %v150_v61  ;;  %v179_v54 = vsub.f32 %v1346_v4, %v178_v25  ;;  %v192_v55 = vand.u32 4294901760, %v1362_v19 }
  0x15   :  { %v166_v35 = vand.u32 4294901760, %v165_v46  ;;  %v173_v39 = vand.u32 4294901760, %v172_v27  ;;  %v186_v56 = vsub.f32 %v1349_v5, %v185_v33  ;;  %v199_v36 = vand.u32 4294901760, %v1367_v20 }
  0x16   :  { %1011 = vmatpush3.bf16.msra.mxu1 %v1257_v32  ;;  %1083 = vmatpush3.bf16.msra.mxu0 %v1257_v32  ;;  %v1398_v42 = vsub.f32 %v1294_v43, %v71_v49  ;;  %v1403_v59 = vsub.f32 %v1299_v44, %v74_v50  ;;  %v1103_v60 = vpack.c.bf16 %v171_v17, %v164_v16  ;;  %v180_v61 = vand.u32 4294901760, %v179_v54 }
  0x17   :  { %1012 = vmatprep.subr.bf16.mxu1 %v1153_v0  ;;  %1084 = vmatprep.subr.bf16.mxu0 %v1153_v0  ;;  %v193_v62 = vsub.f32 %v1362_v19, %v192_v55  ;;  %v206_v1 = vand.u32 4294901760, %v1378_v28  ;;  %v1031_v2 = vpack.c.bf16 %v173_v39, %v166_v35  ;;  %v187_v3 = vand.u32 4294901760, %v186_v56 }
  0x18   :  { %v213_v43 = vand.u32 4294901760, %v1383_v34  ;;  %v1106_v44 = vpack.c.bf16 %v185_v33, %v178_v25  ;;  %v1109_v15 = vpack.c.bf16 %v199_v36, %v192_v55  ;;  %v1049_v54 = vpack.c.bf16 %v1275_v38, %v1273_v37 }
  0x19   :  { %v194_v49 = vand.u32 4294901760, %v193_v62  ;;  %v207_v50 = vsub.f32 %v1378_v28, %v206_v1  ;;  %v1034_v9 = vpack.c.bf16 %v187_v3, %v180_v61 }
  0x1a   :  { %1014 = vmatpush3.bf16.msra.mxu1 %v1288_v41  ;;  %1086 = vmatpush3.bf16.msra.mxu0 %v1288_v41  ;;  %v214_v11 = vsub.f32 %v1383_v34, %v213_v43 }
  0x1b   :  { %1015 = vmatprep.subr.bf16.mxu1 %v1153_v0  ;;  %1087 = vmatprep.subr.bf16.mxu0 %v1153_v0  ;;  %v208_v16 = vand.u32 4294901760, %v207_v50 }
  0x1e   :  { %1017 = vmatpush3.bf16.msra.mxu1 %v1319_v53  ;;  %1089 = vmatpush3.bf16.msra.mxu0 %v1319_v53 }
  0x1f   :  { %1018 = vmatprep.subr.bf16.mxu1 %v1153_v0  ;;  %1090 = vmatprep.subr.bf16.mxu0 %v1153_v0 }
  0x22   :  { %1020 = vmatpush3.bf16.msra.mxu1 %v1340_v63  ;;  %1092 = vmatpush3.bf16.msra.mxu0 %v1340_v63 }
  0x23   :  { %1021 = vmatprep.subr.bf16.mxu1 %v1153_v0  ;;  %1093 = vmatprep.subr.bf16.mxu0 %v1153_v0 }
  0x25   :  { %820 = vmatmul.mubr.f32.vlgmr.msra.gmra.mrb[0].mxu1 %v113_v7  ;;  %925 = vmatmul.mubr.f32.vlgmr.msra.gmra.mrb[0].mxu0 %v111_v51  ;;  %v1028_v51 = vpack.c.bf16 %v159_v24, %v152_v22  ;;  %v220_v7 = vand.u32 4294901760, %v1398_v42 }
  0x26   :  { %1023 = vmatpush3.bf16.msra.mxu1 %v1022_v14  ;;  %1095 = vmatpush3.bf16.msra.mxu0 %v1094_v6  ;;  %v200_v6 = vsub.f32 %v1367_v20, %v199_v36  ;;  %v227_v14 = vand.u32 4294901760, %v1403_v59 }
  0x27   :  { %1024 = vmatprep.subr.bf16.mxu1 %v1153_v0  ;;  %1096 = vmatprep.subr.bf16.mxu0 %v1153_v0  ;;  %v221_v22 = vsub.f32 %v1398_v42, %v220_v7 }
  0x28   :  { %854 = vmatprep.mubr.msk.f32.mxu1 %vm1154_vm0, %v1155_v8  ;;  %959 = vmatprep.mubr.msk.f32.mxu0 %vm1154_vm0, %v1155_v8  ;;  %v201_v10 = vand.u32 4294901760, %v200_v6  ;;  %v228_v24 = vsub.f32 %v1403_v59, %v227_v14 }
  0x29   :  { %v222_v46 = vand.u32 4294901760, %v221_v22 }
  0x2a   :  { %1026 = vmatpush3.bf16.msra.mxu1 %v1025_v45  ;;  %1098 = vmatpush3.bf16.msra.mxu0 %v1097_v21  ;;  %v1037_v17 = vpack.c.bf16 %v201_v10, %v194_v49  ;;  %v215_v21 = vand.u32 4294901760, %v214_v11  ;;  %v1112_v45 = vpack.c.bf16 %v213_v43, %v206_v1  ;;  %v229_v27 = vand.u32 4294901760, %v228_v24 }
  0x2b   :  { %1027 = vmatprep.subr.bf16.mxu1 %v1153_v0  ;;  %1099 = vmatprep.subr.bf16.mxu0 %v1153_v0 }
  0x2c   :  { %v1040_v25 = vpack.c.bf16 %v215_v21, %v208_v16  ;;  %v1043_v33 = vpack.c.bf16 %v229_v27, %v222_v46 }
  0x2e   :  { %1029 = vmatpush3.bf16.msra.mxu1 %v1028_v51  ;;  %1101 = vmatpush3.bf16.msra.mxu0 %v1100_v52  ;;  %v1115_v51 = vpack.c.bf16 %v227_v14, %v220_v7  ;;  %v1046_v52 = vpack.c.bf16 %v1253_v31, %v1248_v29  ;;  %v1052_v29 = vpack.c.bf16 %v1307_v48, %v1305_v47 }
  0x2f   :  { %1030 = vmatprep.subr.bf16.mxu1 %v1153_v0  ;;  %1102 = vmatprep.subr.bf16.mxu0 %v1153_v0 }
  0x32   :  { %1032 = vmatpush3.bf16.msra.mxu1 %v1031_v2  ;;  %1104 = vmatpush3.bf16.msra.mxu0 %v1103_v60 }
  0x33   :  { %1033 = vmatprep.subr.bf16.mxu1 %v1153_v0  ;;  %1105 = vmatprep.subr.bf16.mxu0 %v1153_v0 }
  0x36   :  { %1035 = vmatpush3.bf16.msra.mxu1 %v1034_v9  ;;  %1107 = vmatpush3.bf16.msra.mxu0 %v1106_v44 }
  0x37   :  { %1036 = vmatprep.subr.bf16.mxu1 %v1153_v0  ;;  %1108 = vmatprep.subr.bf16.mxu0 %v1153_v0 }
  0x3a   :  { %1038 = vmatpush3.bf16.msra.mxu1 %v1037_v17  ;;  %1110 = vmatpush3.bf16.msra.mxu0 %v1109_v15 }
  0x3b   :  { %1039 = vmatprep.subr.bf16.mxu1 %v1153_v0  ;;  %1111 = vmatprep.subr.bf16.mxu0 %v1153_v0 }
  0x3e   :  { %1041 = vmatpush3.bf16.msra.mxu1 %v1040_v25  ;;  %1113 = vmatpush3.bf16.msra.mxu0 %v1112_v45 }
  0x3f   :  { %1042 = vmatprep.subr.bf16.mxu1 %v1153_v0  ;;  %1114 = vmatprep.subr.bf16.mxu0 %v1153_v0 }
  0x42   :  { %1044 = vmatpush3.bf16.msra.mxu1 %v1043_v33  ;;  %1116 = vmatpush3.bf16.msra.mxu0 %v1115_v51 }
  0x43   :  { %1045 = vmatprep.subr.bf16.mxu1 %v1153_v0  ;;  %1117 = vmatprep.subr.bf16.mxu0 %v1153_v0 }
  0x45   :  { %855 = vmatmul.mubr.f32.vlgmr.msra.gmra.mrb[0].mxu1 %v1251_v30  ;;  %960 = vmatmul.mubr.f32.vlgmr.msra.gmra.mrb[0].mxu0 %v1251_v30 }
  0x46   :  { %1047 = vmatpush3.bf16.msra.mxu1 %v1046_v52  ;;  %1119 = vmatpush3.bf16.msra.mxu0 %v1195_v12  ;;  %v1055_v12 = vpack.c.bf16 %v1328_v58, %v1326_v57 }
  0x47   :  { %1048 = vmatprep.subr.bf16.mxu1 %v1153_v0  ;;  %1120 = vmatprep.subr.bf16.mxu0 %v1153_v0 }
  0x48   :  { %889 = vmatprep.mubr.msk.f32.mxu1 %vm1154_vm0, %v1155_v8  ;;  %994 = vmatprep.mubr.msk.f32.mxu0 %vm1154_vm0, %v1155_v8  ;;  %v1058_v8 = vpack.c.bf16 %v1349_v5, %v1346_v4 }
  0x4a   :  { %1050 = vmatpush3.bf16.msra.mxu1 %v1049_v54  ;;  %1122 = vmatpush3.bf16.msra.mxu0 %v1199_v13  ;;  %v1061_v13 = vpack.c.bf16 %v1367_v20, %v1362_v19 }
  0x4b   :  { %1051 = vmatprep.subr.bf16.mxu1 %v1153_v0  ;;  %1123 = vmatprep.subr.bf16.mxu0 %v1153_v0 }
  0x4e   :  { %1053 = vmatpush3.bf16.msra.mxu1 %v1052_v29  ;;  %1125 = vmatpush3.bf16.msra.mxu0 %v1211_v18  ;;  %v1064_v18 = vpack.c.bf16 %v1383_v34, %v1378_v28 }
  0x4f   :  { %1054 = vmatprep.subr.bf16.mxu1 %v1153_v0  ;;  %1126 = vmatprep.subr.bf16.mxu0 %v1153_v0 }
  0x52   :  { %1056 = vmatpush3.bf16.msra.mxu1 %v1055_v12  ;;  %1128 = vmatpush3.bf16.msra.mxu0 %v1227_v23  ;;  %v1067_v23 = vpack.c.bf16 %v1403_v59, %v1398_v42 }
  0x53   :  { %1057 = vmatprep.subr.bf16.mxu1 %v1153_v0  ;;  %1129 = vmatprep.subr.bf16.mxu0 %v1153_v0 }
  0x56   :  { %1059 = vmatpush3.bf16.msra.mxu1 %v1058_v8  ;;  %1131 = vmatpush3.bf16.msra.mxu0 %v1257_v32 }
  0x57   :  { %1060 = vmatprep.subr.bf16.mxu1 %v1153_v0  ;;  %1132 = vmatprep.subr.bf16.mxu0 %v1153_v0 }
  0x5a   :  { %1062 = vmatpush3.bf16.msra.mxu1 %v1061_v13  ;;  %1134 = vmatpush3.bf16.msra.mxu0 %v1288_v41 }
  0x5b   :  { %1063 = vmatprep.subr.bf16.mxu1 %v1153_v0  ;;  %1135 = vmatprep.subr.bf16.mxu0 %v1153_v0 }
  0x5e   :  { %1065 = vmatpush3.bf16.msra.mxu1 %v1064_v18  ;;  %1137 = vmatpush3.bf16.msra.mxu0 %v1319_v53  ;;  %v674_v53 = vmul.f32 %v1234_v26, %v1234_v26 }
  0x5f   :  { %1066 = vmatprep.subr.bf16.mxu1 %v1153_v0  ;;  %1138 = vmatprep.subr.bf16.mxu0 %v1153_v0 }
  0x62   :  { %1068 = vmatpush3.bf16.msra.mxu1 %v1067_v23  ;;  %1140 = vmatpush3.bf16.msra.mxu0 %v1340_v63 }
  0x65   :  { %890 = vmatmul.mubr.f32.vlgmr.msra.gmra.mrb[0].mxu1 %v1280_v40  ;;  %995 = vmatmul.mubr.f32.vlgmr.msra.gmra.mrb[0].mxu0 %v1251_v30 }
 0x138   :  { %v370_v31 = vpop.f32.mrb[0].mxu1  ;;  %v665_v32 = vpop.f32.mrb[0].mxu0 }
 0x139   :  { %v1141_v37 = vadd.f32 %v665_v32, %v370_v31  ;;  %v891_v38 = vpop.f32.mrb[1].mxu1  ;;  %v996_v41 = vpop.f32.mrb[1].mxu0 }
 0x13b   :  { %v669_v47 = vmul.f32 %v1141_v37, %v1141_v37 }
 0x13d   :  { %v671_v48 = vsel %vm670_vm1, %v669_v47, 0.0 }
 0x13e   :  { %672 = vadd.xlane.f32.xlu0 %v671_v48 }
 0x142   :  { %675 = vadd.xlane.f32.xlu0 %v674_v53 }
 0x1cb   :  { %v673_v0 = vpop.xlane.xlu0 %672 }
 0x1cf   :  { %v676_v57 = vpop.xlane.xlu0 %675 }
 0x1d0   :  { %v677_v58 = vsub.f32 %v673_v0, %v676_v57 }
 0x1d2   :  { %v678_v40 = vmul.f32 0.5, %v677_v58 }
 0x1d4   :  { %680 = vst.msk [vmem:[%s1480_s2] sm:$0xff] %vm679_vm2, %v678_v40 }

</bundles_post_ra>
